<compile_context>
chip_gen: v7x
topology: tpu7x:2x2x1
jax: 0.10.0
libtpu: 0.0.40
codegen_flags: <defaults>
</compile_context>

<pallas_src>
import jax
import jax.numpy as jnp
from jax.experimental import pallas as pl
from jax.experimental.pallas import tpu as pltpu


def _round_up(n, m):
    return ((n + m - 1) // m) * m


def policy_kernel(x_ref, w1_ref, b1_ref, w2_ref, b2_ref, w3_ref, b3_ref, o_ref):
    # fc1 + relu (f32 operands, f32 accumulation)
    h1 = jnp.dot(x_ref[...], w1_ref[...], preferred_element_type=jnp.float32)
    h1 = jnp.maximum(h1 + b1_ref[...], 0.0)

    # fc2 + relu
    h2 = jnp.dot(h1, w2_ref[...], preferred_element_type=jnp.float32)
    h2 = jnp.maximum(h2 + b2_ref[...], 0.0)

    # fc3 (output columns padded to 128; padded bias = -1e30 so exp(.) == 0)
    logits = jnp.dot(h2, w3_ref[...], preferred_element_type=jnp.float32)
    logits = logits + b3_ref[...]

    # numerically stable softmax over the (padded) last dim; exact divide so
    # probabilities sum to 1 to f32 precision.
    m = jnp.max(logits, axis=-1, keepdims=True)
    e = jnp.exp(logits - m)
    denom = jnp.sum(e, axis=-1, keepdims=True)
    o_ref[...] = (e / denom).astype(o_ref.dtype)


def policy_network_forward(x, params, *, tb=2048):
    """x: (B, input_dim) f32.  params: (w1,b1,w2,b2,w3,b3) all f32, weights (in,out)."""
    w1, b1, w2, b2, w3, b3 = params
    B, input_dim = x.shape
    out_dim = w3.shape[1]

    # Pad fc3 to a lane-dense output width (multiple of 128). Padded weight
    # columns are zero; padded bias is a large negative so those logits vanish
    # under exp() and do not perturb the softmax denominator.
    out_pad = _round_up(max(out_dim, 128), 128)
    if out_pad != out_dim:
        w3p = jnp.pad(w3, ((0, 0), (0, out_pad - out_dim)))
        b3p = jnp.pad(b3, ((0, 0), (0, out_pad - out_dim)), constant_values=-1e30)
    else:
        w3p, b3p = w3, b3

    # Batch tiling: one grid step for small/medium batches (per-step overhead
    # dominates); for larger batches >=2 tiles of size tb so v7x's two
    # TensorCores each get work via the "parallel" dimension semantics.
    if B <= tb:
        tb_eff = _round_up(B, 8)          # single (possibly ragged) tile
    else:
        tb_eff = _round_up(tb, 8)
    grid = (pl.cdiv(B, tb_eff),)          # ragged edge block handled by Pallas

    # Weights/biases: full-array blocks with constant index_map -> loaded once,
    # VMEM-resident across all batch tiles.
    def const_spec(a):
        return pl.BlockSpec(a.shape, lambda i: (0, 0))

    out = pl.pallas_call(
        policy_kernel,
        out_shape=jax.ShapeDtypeStruct((B, out_pad), jnp.float32),
        grid=grid,
        in_specs=[
            pl.BlockSpec((tb_eff, input_dim), lambda i: (i, 0)),  # x tile
            const_spec(w1), const_spec(b1),
            const_spec(w2), const_spec(b2),
            const_spec(w3p), const_spec(b3p),
        ],
        out_specs=pl.BlockSpec((tb_eff, out_pad), lambda i: (i, 0)),
        compiler_params=pltpu.CompilerParams(
            dimension_semantics=("parallel",)),  # shard batch tiles across v7x's 2 TCs
    )(x, w1, b1, w2, b2, w3p, b3p)

    return out[:, :out_dim]


def init_params(key, input_dim=4, hidden1=128, hidden2=64, output_dim=4):
    # Deterministic synthetic initialization (uniform, Torch-Linear-like bounds).
    # Everything stays f32: matches module semantics and is free at these shapes.
    ks = jax.random.split(key, 6)

    def lin(kw, kb, fan_in, fan_out):
        bound = 1.0 / jnp.sqrt(fan_in)
        w = jax.random.uniform(kw, (fan_in, fan_out), jnp.float32, -bound, bound)
        b = jax.random.uniform(kb, (1, fan_out), jnp.float32, -bound, bound)
        return w, b

    w1, b1 = lin(ks[0], ks[1], input_dim, hidden1)
    w2, b2 = lin(ks[2], ks[3], hidden1, hidden2)
    w3, b3 = lin(ks[4], ks[5], hidden2, output_dim)
    return (w1, b1, w2, b2, w3, b3)


def reference_forward_f32(x, params):
    """Pure-JAX f32 reference (PyTorch-spec semantics)."""
    w1, b1, w2, b2, w3, b3 = params
    h1 = jnp.maximum(x @ w1 + b1, 0.0)
    h2 = jnp.maximum(h1 @ w2 + b2, 0.0)
    return jax.nn.softmax(h2 @ w3 + b3, axis=-1)


if __name__ == "__main__":
    key = jax.random.PRNGKey(0)
    k_params, k_x = jax.random.split(key)

    input_dim, output_dim = 4, 4
    batch = 200  # deliberately not a multiple of 8 or of any tile -> ragged edge block

    params = init_params(k_params, input_dim=input_dim, output_dim=output_dim)
    x = jax.random.normal(k_x, (batch, input_dim), dtype=jnp.float32)

    ref = reference_forward_f32(x, params)

    # Default path: B <= tb -> single grid step (the common small/medium-batch case).
    out = jax.block_until_ready(policy_network_forward(x, params))
    assert out.shape == (batch, output_dim)
    assert jnp.allclose(out, ref, atol=1e-5, rtol=1e-5), "mismatch vs f32 reference (1 tile)"
    assert jnp.allclose(jnp.sum(out, axis=-1), 1.0, atol=1e-5), "rows do not sum to 1"

    # Multi-tile path: forces grid=(4,) with a partial edge block (v7x megacore path).
    out_mt = jax.block_until_ready(policy_network_forward(x, params, tb=64))
    assert out_mt.shape == (batch, output_dim)
    assert jnp.allclose(out_mt, ref, atol=1e-5, rtol=1e-5), "mismatch vs f32 reference (multi-tile)"
    assert jnp.allclose(jnp.sum(out_mt, axis=-1), 1.0, atol=1e-5), "rows do not sum to 1 (multi-tile)"

    print("KERNEL_OK")
</pallas_src>

<mosaic_0001>
module attributes {stable_mosaic.version = 11 : i64} {
  func.func @policy_kernel(%arg0: i32, %arg1: memref<200x4xf32, #tpu.memory_space<vmem>>, %arg2: memref<4x128xf32, #tpu.memory_space<vmem>>, %arg3: memref<1x128xf32, #tpu.memory_space<vmem>>, %arg4: memref<128x64xf32, #tpu.memory_space<vmem>>, %arg5: memref<1x64xf32, #tpu.memory_space<vmem>>, %arg6: memref<64x128xf32, #tpu.memory_space<vmem>>, %arg7: memref<1x128xf32, #tpu.memory_space<vmem>>, %arg8: memref<200x128xf32, #tpu.memory_space<vmem>>) attributes {dimension_semantics = [#tpu.dimension_semantics<parallel>], iteration_bounds = array<i64: 1>, scalar_prefetch = 0 : i64, scratch_operands = 0 : i64, tpu.core_type = #tpu.core_type<tc>, window_params = [{transform_indices = @transform_0, window_bounds = array<i64: 200, 4>}, {pipeline_mode = #tpu.pipeline_mode<synchronous>, transform_indices = @transform_1, window_bounds = array<i64: 4, 128>}, {pipeline_mode = #tpu.pipeline_mode<synchronous>, transform_indices = @transform_2, window_bounds = array<i64: 1, 128>}, {pipeline_mode = #tpu.pipeline_mode<synchronous>, transform_indices = @transform_3, window_bounds = array<i64: 128, 64>}, {pipeline_mode = #tpu.pipeline_mode<synchronous>, transform_indices = @transform_4, window_bounds = array<i64: 1, 64>}, {pipeline_mode = #tpu.pipeline_mode<synchronous>, transform_indices = @transform_5, window_bounds = array<i64: 64, 128>}, {pipeline_mode = #tpu.pipeline_mode<synchronous>, transform_indices = @transform_6, window_bounds = array<i64: 1, 128>}, {transform_indices = @transform_7, window_bounds = array<i64: 200, 128>}]} {
    %c0 = arith.constant 0 : index
    %c0_0 = arith.constant 0 : index
    %0 = vector.load %arg1[%c0, %c0_0] : memref<200x4xf32, #tpu.memory_space<vmem>>, vector<200x4xf32>
    %c0_1 = arith.constant 0 : index
    %c0_2 = arith.constant 0 : index
    %1 = vector.load %arg2[%c0_1, %c0_2] : memref<4x128xf32, #tpu.memory_space<vmem>>, vector<4x128xf32>
    %cst = arith.constant dense<0.000000e+00> : vector<200x128xf32>
    %2 = tpu.matmul %0, %1, %cst {dimension_numbers = #tpu.dot_dimension_numbers<[1], [0], [0], [1], [0, 0, 1, 1], [], []>} : vector<200x4xf32>, vector<4x128xf32>, vector<200x128xf32> -> vector<200x128xf32>
    %c0_3 = arith.constant 0 : index
    %c0_4 = arith.constant 0 : index
    %3 = vector.load %arg3[%c0_3, %c0_4] : memref<1x128xf32, #tpu.memory_space<vmem>>, vector<1x128xf32>
    %4 = vector.broadcast %3 : vector<1x128xf32> to vector<200x128xf32>
    %5 = arith.addf %2, %4 : vector<200x128xf32>
    %cst_5 = arith.constant 0.000000e+00 : f32
    %6 = vector.broadcast %cst_5 : f32 to vector<200x128xf32>
    %7 = arith.maximumf %5, %6 : vector<200x128xf32>
    %c0_6 = arith.constant 0 : index
    %c0_7 = arith.constant 0 : index
    %8 = vector.load %arg4[%c0_6, %c0_7] : memref<128x64xf32, #tpu.memory_space<vmem>>, vector<128x64xf32>
    %cst_8 = arith.constant dense<0.000000e+00> : vector<200x64xf32>
    %9 = tpu.matmul %7, %8, %cst_8 {dimension_numbers = #tpu.dot_dimension_numbers<[1], [0], [0], [1], [0, 0, 1, 1], [], []>} : vector<200x128xf32>, vector<128x64xf32>, vector<200x64xf32> -> vector<200x64xf32>
    %c0_9 = arith.constant 0 : index
    %c0_10 = arith.constant 0 : index
    %10 = vector.load %arg5[%c0_9, %c0_10] : memref<1x64xf32, #tpu.memory_space<vmem>>, vector<1x64xf32>
    %11 = vector.broadcast %10 : vector<1x64xf32> to vector<200x64xf32>
    %12 = arith.addf %9, %11 : vector<200x64xf32>
    %cst_11 = arith.constant 0.000000e+00 : f32
    %13 = vector.broadcast %cst_11 : f32 to vector<200x64xf32>
    %14 = arith.maximumf %12, %13 : vector<200x64xf32>
    %c0_12 = arith.constant 0 : index
    %c0_13 = arith.constant 0 : index
    %15 = vector.load %arg6[%c0_12, %c0_13] : memref<64x128xf32, #tpu.memory_space<vmem>>, vector<64x128xf32>
    %cst_14 = arith.constant dense<0.000000e+00> : vector<200x128xf32>
    %16 = tpu.matmul %14, %15, %cst_14 {dimension_numbers = #tpu.dot_dimension_numbers<[1], [0], [0], [1], [0, 0, 1, 1], [], []>} : vector<200x64xf32>, vector<64x128xf32>, vector<200x128xf32> -> vector<200x128xf32>
    %c0_15 = arith.constant 0 : index
    %c0_16 = arith.constant 0 : index
    %17 = vector.load %arg7[%c0_15, %c0_16] : memref<1x128xf32, #tpu.memory_space<vmem>>, vector<1x128xf32>
    %18 = vector.broadcast %17 : vector<1x128xf32> to vector<200x128xf32>
    %19 = arith.addf %16, %18 : vector<200x128xf32>
    %cst_17 = arith.constant dense<0xFF800000> : vector<200xf32>
    %20 = vector.multi_reduction <maximumf>, %19, %cst_17 [1] : vector<200x128xf32> to vector<200xf32>
    %21 = vector.shape_cast %20 : vector<200xf32> to vector<200x1xf32>
    %22 = vector.broadcast %21 : vector<200x1xf32> to vector<200x128xf32>
    %23 = arith.subf %19, %22 : vector<200x128xf32>
    %24 = math.exp %23 : vector<200x128xf32>
    %cst_18 = arith.constant dense<0.000000e+00> : vector<200xf32>
    %25 = vector.multi_reduction <add>, %24, %cst_18 [1] : vector<200x128xf32> to vector<200xf32>
    %26 = vector.shape_cast %25 : vector<200xf32> to vector<200x1xf32>
    %27 = vector.broadcast %26 : vector<200x1xf32> to vector<200x128xf32>
    %28 = arith.divf %24, %27 : vector<200x128xf32>
    %c0_19 = arith.constant 0 : index
    %c0_20 = arith.constant 0 : index
    %29 = vector.load %arg8[%c0_19, %c0_20] : memref<200x128xf32, #tpu.memory_space<vmem>>, vector<200x128xf32>
    tpu.vector_store %arg8[%c0_19, %c0_20], %28 {strides = array<i32>} : memref<200x128xf32, #tpu.memory_space<vmem>>, vector<200x128xf32>,
    return
  }
  func.func @transform_0(%arg0: i32) -> (i32, i32) {
    %c0_i32 = arith.constant 0 : i32
    %c0_i32_0 = arith.constant 0 : i32
    return %arg0, %c0_i32 : i32, i32
  }
  func.func @transform_1(%arg0: i32) -> (i32, i32) {
    %c0_i32 = arith.constant 0 : i32
    %c0_i32_0 = arith.constant 0 : i32
    %c0_i32_1 = arith.constant 0 : i32
    return %c0_i32, %c0_i32_0 : i32, i32
  }
  func.func @transform_2(%arg0: i32) -> (i32, i32) {
    %c0_i32 = arith.constant 0 : i32
    %c0_i32_0 = arith.constant 0 : i32
    %c0_i32_1 = arith.constant 0 : i32
    return %c0_i32, %c0_i32_0 : i32, i32
  }
  func.func @transform_3(%arg0: i32) -> (i32, i32) {
    %c0_i32 = arith.constant 0 : i32
    %c0_i32_0 = arith.constant 0 : i32
    %c0_i32_1 = arith.constant 0 : i32
    return %c0_i32, %c0_i32_0 : i32, i32
  }
  func.func @transform_4(%arg0: i32) -> (i32, i32) {
    %c0_i32 = arith.constant 0 : i32
    %c0_i32_0 = arith.constant 0 : i32
    %c0_i32_1 = arith.constant 0 : i32
    return %c0_i32, %c0_i32_0 : i32, i32
  }
  func.func @transform_5(%arg0: i32) -> (i32, i32) {
    %c0_i32 = arith.constant 0 : i32
    %c0_i32_0 = arith.constant 0 : i32
    %c0_i32_1 = arith.constant 0 : i32
    return %c0_i32, %c0_i32_0 : i32, i32
  }
  func.func @transform_6(%arg0: i32) -> (i32, i32) {
    %c0_i32 = arith.constant 0 : i32
    %c0_i32_0 = arith.constant 0 : i32
    %c0_i32_1 = arith.constant 0 : i32
    return %c0_i32, %c0_i32_0 : i32, i32
  }
  func.func @transform_7(%arg0: i32) -> (i32, i32) {
    %c0_i32 = arith.constant 0 : i32
    %c0_i32_0 = arith.constant 0 : i32
    return %arg0, %c0_i32 : i32, i32
  }
}

</mosaic_0001>

<bundles_post_ra>
// kernel: tpu_custom_call.1
= control target key start
LH: loop header
LB: loop body
LE: loop exit
PB: predicated region body
PF: predicated region fallthrough
CT: control target
= control target key end

     0   :  { %vm136_vm0 = vcmask 1043456   ;;  %v1737_v2 = vmov 0.0   ;;  %vm1738_vm1 = vmmov 0   ;;  %vm60_vm2 = vcmask 31744   ;;  %s2476_s0 = inlined_call_operand.vmem [shape: f32[200,4], index: 0, kind: input, shape index: {}]   ;;  %s2477_s1 = inlined_call_operand.vmem [shape: f32[4,128], index: 1, kind: input, shape index: {}]   ;;  %s2478_s2 = inlined_call_operand.vmem [shape: f32[1,128], index: 2, kind: input, shape index: {}]   ;;  %s2479_s3 = inlined_call_operand.vmem [shape: f32[128,64], index: 3, kind: input, shape index: {}]   ;;  %s2480_s4 = inlined_call_operand.vmem [shape: f32[1,64], index: 4, kind: input, shape index: {}]   ;;  %s2481_s5 = inlined_call_operand.vmem [shape: f32[64,128], index: 5, kind: input, shape index: {}]   ;;  %s2482_s6 = inlined_call_operand.vmem [shape: f32[1,128], index: 6, kind: input, shape index: {}]   ;;  %s2483_s7 = inlined_call_operand.hbm [shape: f32[200,128], index: 7, kind: output, shape index: {}]  }
   0x1   :  { %v52_v0 = vld [vmem:[%s2477_s1] sm:$0xf]  ;;  %1294 = vmatprep.subr.mxu0 %v1737_v2  ;;  %1296 = vmatprep.mubr.msk.f32.mxu0 %vm1738_vm1, %v1737_v2  ;;  %v28_v3 = vld [vmem:[%s2476_s0 + $0x8] sm:$0xff]  ;;  %v1739_v5 = vmov 0.0|0.0   ;;  %v41_v6 = vld [vmem:[%s2476_s0 + $0x70] sm:$0xff] }
   0x2   :  { %v27_v1 = vld [vmem:[%s2476_s0] sm:$0xff]  ;;  %1295 = vmatpush3.msk.msra.mxu0 %vm136_vm0, %v52_v0  ;;  %1605 = vmatprep.subr.mxu1 %v1737_v2  ;;  %v40_v4 = vld [vmem:[%s2476_s0 + $0x68] sm:$0xff]  ;;  %v29_v7 = vld [vmem:[%s2476_s0 + $0x10] sm:$0xff] }
   0x3   :  { %1297 = vmatmul.mubr.msk.f32.vlgmr.msra.gmra.mrb[0].mxu0 %vm60_vm2, %v27_v1  ;;  %1606 = vmatpush3.msk.msra.mxu1 %vm136_vm0, %v52_v0  ;;  %v355_v8 = vld [vmem:[%s2479_s3] sm:$0xff]  ;;  %v356_v9 = vld [vmem:[%s2479_s3 + $0x8] sm:$0xff]  ;;  %v357_v10 = vld [vmem:[%s2479_s3 + $0x10] sm:$0xff] }
   0x4   :  { %1299 = vmatprep.mubr.msk.f32.mxu0 %vm1738_vm1, %v1737_v2  ;;  %1335 = vmatprep.mubr.msk.f32.mxu1 %vm1738_vm1, %v1737_v2  ;;  %v1570_v11 = vpack.c.bf16 %v356_v9, %v355_v8  ;;  %v358_v12 = vld [vmem:[%s2479_s3 + $0x18] sm:$0xff]  ;;  %v359_v16 = vld [vmem:[%s2479_s3 + $0x20] sm:$0xff]  ;;  %v360_v17 = vld [vmem:[%s2479_s3 + $0x28] sm:$0xff] }
   0x5   :  { %1569 = vmatprep.subr.bf16.mxu1 %v1739_v5  ;;  %1593 = vmatprep.subr.bf16.mxu0 %v1739_v5  ;;  %v42_v13 = vld [vmem:[%s2476_s0 + $0x78] sm:$0xff]  ;;  %v1573_v15 = vpack.c.bf16 %v358_v12, %v357_v10 }
   0x6   :  { %1336 = vmatmul.mubr.msk.f32.vlgmr.msra.gmra.mrb[0].mxu1 %vm60_vm2, %v40_v4  ;;  %v30_v14 = vld [vmem:[%s2476_s0 + $0x18] sm:$0xff] }
   0x7   :  { %1300 = vmatmul.mubr.msk.f32.gmra.mrb[2].mxu0 %vm60_vm2, %v28_v3  ;;  %1338 = vmatprep.mubr.msk.f32.mxu1 %vm1738_vm1, %v1737_v2 }
   0x8   :  { %1302 = vmatprep.mubr.msk.f32.mxu0 %vm1738_vm1, %v1737_v2  ;;  %1571 = vmatpush3.bf16.msra.mxu1 %v1570_v11 }
   0x9   :  { %1572 = vmatprep.subr.bf16.mxu1 %v1739_v5 }
   0xa   :  { %1339 = vmatmul.mubr.msk.f32.gmra.mrb[2].mxu1 %vm60_vm2, %v41_v6 }
   0xb   :  { %1303 = vmatmul.mubr.msk.f32.gmra.mrb[4].mxu0 %vm60_vm2, %v29_v7  ;;  %1341 = vmatprep.mubr.msk.f32.mxu1 %vm1738_vm1, %v1737_v2 }
   0xc   :  { %1305 = vmatprep.mubr.msk.f32.mxu0 %vm1738_vm1, %v1737_v2 }
   0xe   :  { %1342 = vmatmul.mubr.msk.f32.gmra.mrb[4].mxu1 %vm60_vm2, %v42_v13 }
   0xf   :  { %12 = vsyncpa [#allocation3], 0  ;;  %1306 = vmatmul.mubr.msk.f32.gmra.mrb[6].mxu0 %vm60_vm2, %v30_v14  ;;  %1344 = vmatprep.mubr.msk.f32.mxu1 %vm1738_vm1, %v1737_v2  ;;  %v43_v18 = vld [vmem:[%s2476_s0 + $0x80] sm:$0xff]  ;;  %v1576_v20 = vpack.c.bf16 %v360_v17, %v359_v16  ;;  %v361_v21 = vld [vmem:[%s2479_s3 + $0x30] sm:$0xff]  ;;  %vm608_vm3 = vcmask 523264  }
  0x10   :  { %1308 = vmatprep.mubr.msk.f32.mxu0 %vm1738_vm1, %v1737_v2  ;;  %v31_v19 = vld [vmem:[%s2476_s0 + $0x20] sm:$0xff]  ;;  %1574 = vmatpush3.bf16.msra.mxu1 %v1573_v15  ;;  %v362_v22 = vld [vmem:[%s2479_s3 + $0x38] sm:$0xff]  ;;  %v44_v23 = vld [vmem:[%s2476_s0 + $0x88] sm:$0xff] }
  0x11   :  { %1575 = vmatprep.subr.bf16.mxu1 %v1739_v5  ;;  %v32_v24 = vld [vmem:[%s2476_s0 + $0x28] sm:$0xff]  ;;  %v1579_v25 = vpack.c.bf16 %v362_v22, %v361_v21  ;;  %v363_v26 = vld [vmem:[%s2479_s3 + $0x40] sm:$0xff]  ;;  %v45_v28 = vld [vmem:[%s2476_s0 + $0x90] sm:$0xff] }
  0x12   :  { %1345 = vmatmul.mubr.msk.f32.gmra.mrb[6].mxu1 %vm60_vm2, %v43_v18  ;;  %v364_v27 = vld [vmem:[%s2479_s3 + $0x48] sm:$0xff]  ;;  %v33_v29 = vld [vmem:[%s2476_s0 + $0x30] sm:$0xff]  ;;  %v366_v32 = vld [vmem:[%s2479_s3 + $0x58] sm:$0xff] }
  0x13   :  { %1309 = vmatmul.mubr.msk.f32.gmra.mrb[8].mxu0 %vm60_vm2, %v31_v19  ;;  %1347 = vmatprep.mubr.msk.f32.mxu1 %vm1738_vm1, %v1737_v2  ;;  %v1582_v30 = vpack.c.bf16 %v364_v27, %v363_v26  ;;  %v365_v31 = vld [vmem:[%s2479_s3 + $0x50] sm:$0xff]  ;;  %v46_v33 = vld [vmem:[%s2476_s0 + $0x98] sm:$0xff]  ;;  %v367_v36 = vld [vmem:[%s2479_s3 + $0x60] sm:$0xff] }
  0x14   :  { %1311 = vmatprep.mubr.msk.f32.mxu0 %vm1738_vm1, %v1737_v2  ;;  %1577 = vmatpush3.bf16.msra.mxu1 %v1576_v20  ;;  %v34_v34 = vld [vmem:[%s2476_s0 + $0x38] sm:$0xff]  ;;  %v1585_v35 = vpack.c.bf16 %v366_v32, %v365_v31  ;;  %v368_v37 = vld [vmem:[%s2479_s3 + $0x68] sm:$0xff]  ;;  %v47_v38 = vld [vmem:[%s2476_s0 + $0xa0] sm:$0xff] }
  0x15   :  { %1578 = vmatprep.subr.bf16.mxu1 %v1739_v5  ;;  %v35_v39 = vld [vmem:[%s2476_s0 + $0x40] sm:$0xff]  ;;  %v1588_v40 = vpack.c.bf16 %v368_v37, %v367_v36  ;;  %v369_v41 = vld [vmem:[%s2479_s3 + $0x70] sm:$0xff]  ;;  %v370_v42 = vld [vmem:[%s2479_s3 + $0x78] sm:$0xff] }
  0x16   :  { %1348 = vmatmul.mubr.msk.f32.gmra.mrb[8].mxu1 %vm60_vm2, %v44_v23  ;;  %v48_v43 = vld [vmem:[%s2476_s0 + $0xa8] sm:$0xff]  ;;  %v1591_v45 = vpack.c.bf16 %v370_v42, %v369_v41  ;;  %v49_v46 = vld [vmem:[%s2476_s0 + $0xb0] sm:$0xff]  ;;  %v50_v48 = vld [vmem:[%s2476_s0 + $0xb8] sm:$0xff] }
  0x17   :  { %1312 = vmatmul.mubr.msk.f32.gmra.mrb[10].mxu0 %vm60_vm2, %v32_v24  ;;  %1350 = vmatprep.mubr.msk.f32.mxu1 %vm1738_vm1, %v1737_v2  ;;  %v36_v44 = vld [vmem:[%s2476_s0 + $0x48] sm:$0xff]  ;;  %v37_v47 = vld [vmem:[%s2476_s0 + $0x50] sm:$0xff]  ;;  %v38_v49 = vld [vmem:[%s2476_s0 + $0x58] sm:$0xff] }
  0x18   :  { %1314 = vmatprep.mubr.msk.f32.mxu0 %vm1738_vm1, %v1737_v2  ;;  %1580 = vmatpush3.bf16.msra.mxu1 %v1579_v25  ;;  %v51_v50 = vld [vmem:[%s2476_s0 + $0xc0] sm:$0xff]  ;;  %v594_v53 = vld [vmem:[%s2481_s5 + $0x8] sm:$0xff]  ;;  %v595_v54 = vld [vmem:[%s2481_s5 + $0x10] sm:$0xff] }
  0x19   :  { %1581 = vmatprep.subr.bf16.mxu1 %v1739_v5  ;;  %v39_v51 = vld [vmem:[%s2476_s0 + $0x60] sm:$0xff]  ;;  %v596_v56 = vld [vmem:[%s2481_s5 + $0x18] sm:$0xff]  ;;  %v598_v59 = vld [vmem:[%s2481_s5 + $0x28] sm:$0xff] }
  0x1a   :  { %1351 = vmatmul.mubr.msk.f32.gmra.mrb[10].mxu1 %vm60_vm2, %v45_v28  ;;  %v593_v52 = vld [vmem:[%s2481_s5] sm:$0xff]  ;;  %v1597_v57 = vpack.c.bf16 %v596_v56, %v595_v54  ;;  %v599_v61 = vld [vmem:[%s2481_s5 + $0x30] sm:$0xff]  ;;  %v600_v62 = vld [vmem:[%s2481_s5 + $0x38] sm:$0xff] }
  0x1b   :  { %1315 = vmatmul.mubr.msk.f32.gmra.mrb[12].mxu0 %vm60_vm2, %v33_v29  ;;  %1353 = vmatprep.mubr.msk.f32.mxu1 %vm1738_vm1, %v1737_v2  ;;  %v1594_v55 = vpack.c.bf16 %v594_v53, %v593_v52  ;;  %v597_v58 = vld [vmem:[%s2481_s5 + $0x20] sm:$0xff]  ;;  %v1603_v63 = vpack.c.bf16 %v600_v62, %v599_v61 }
  0x1c   :  { %1317 = vmatprep.mubr.msk.f32.mxu0 %vm1738_vm1, %v1737_v2  ;;  %1583 = vmatpush3.bf16.msra.mxu1 %v1582_v30  ;;  %v1600_v60 = vpack.c.bf16 %v598_v59, %v597_v58  ;;  %v2029_v0 = vld [vmem:[%s2478_s2] ss:$0 sm:$0xff] }
  0x1d   :  { %1584 = vmatprep.subr.bf16.mxu1 %v1739_v5  ;;  %1595 = vmatpush3.bf16.msra.mxu0 %v1594_v55 }
  0x1e   :  { %1354 = vmatmul.mubr.msk.f32.gmra.mrb[12].mxu1 %vm60_vm2, %v46_v33  ;;  %1596 = vmatprep.subr.bf16.mxu0 %v1739_v5 }
  0x1f   :  { %1318 = vmatmul.mubr.msk.f32.gmra.mrb[14].mxu0 %vm60_vm2, %v34_v34  ;;  %1356 = vmatprep.mubr.msk.f32.mxu1 %vm1738_vm1, %v1737_v2 }
  0x20   :  { %1320 = vmatprep.mubr.msk.f32.mxu0 %vm1738_vm1, %v1737_v2  ;;  %1586 = vmatpush3.bf16.msra.mxu1 %v1585_v35 }
  0x21   :  { %1587 = vmatprep.subr.bf16.mxu1 %v1739_v5  ;;  %1598 = vmatpush3.bf16.msra.mxu0 %v1597_v57 }
  0x22   :  { %1357 = vmatmul.mubr.msk.f32.gmra.mrb[14].mxu1 %vm60_vm2, %v47_v38  ;;  %1599 = vmatprep.subr.bf16.mxu0 %v1739_v5 }
  0x23   :  { %1321 = vmatmul.mubr.msk.f32.gmra.mrb[16].mxu0 %vm60_vm2, %v35_v39  ;;  %1359 = vmatprep.mubr.msk.f32.mxu1 %vm1738_vm1, %v1737_v2 }
  0x24   :  { %1323 = vmatprep.mubr.msk.f32.mxu0 %vm1738_vm1, %v1737_v2  ;;  %1589 = vmatpush3.bf16.msra.mxu1 %v1588_v40 }
  0x25   :  { %1590 = vmatprep.subr.bf16.mxu1 %v1739_v5  ;;  %1601 = vmatpush3.bf16.msra.mxu0 %v1600_v60 }
  0x26   :  { %1360 = vmatmul.mubr.msk.f32.gmra.mrb[16].mxu1 %vm60_vm2, %v48_v43  ;;  %1602 = vmatprep.subr.bf16.mxu0 %v1739_v5 }
  0x27   :  { %1324 = vmatmul.mubr.msk.f32.gmra.mrb[18].mxu0 %vm60_vm2, %v36_v44  ;;  %1362 = vmatprep.mubr.msk.f32.mxu1 %vm1738_vm1, %v1737_v2 }
  0x28   :  { %1326 = vmatprep.mubr.msk.f32.mxu0 %vm1738_vm1, %v1737_v2  ;;  %1592 = vmatpush3.bf16.msra.mxu1 %v1591_v45 }
  0x29   :  { %1604 = vmatpush3.bf16.msra.mxu0 %v1603_v63 }
  0x2a   :  { %1363 = vmatmul.mubr.msk.f32.gmra.mrb[18].mxu1 %vm60_vm2, %v49_v46 }
  0x2b   :  { %1327 = vmatmul.mubr.msk.f32.gmra.mrb[20].mxu0 %vm60_vm2, %v37_v47  ;;  %1365 = vmatprep.mubr.msk.f32.mxu1 %vm1738_vm1, %v1737_v2 }
  0x2c   :  { %1329 = vmatprep.mubr.msk.f32.mxu0 %vm1738_vm1, %v1737_v2 }
  0x2e   :  { %1366 = vmatmul.mubr.msk.f32.gmra.mrb[20].mxu1 %vm60_vm2, %v50_v48 }
  0x2f   :  { %1330 = vmatmul.mubr.msk.f32.gmra.mrb[22].mxu0 %vm60_vm2, %v38_v49  ;;  %1368 = vmatprep.mubr.msk.f32.mxu1 %vm1738_vm1, %v1737_v2 }
  0x30   :  { %1332 = vmatprep.mubr.msk.f32.mxu0 %vm1738_vm1, %v1737_v2 }
  0x32   :  { %1369 = vmatmul.mubr.msk.f32.gmra.mrb[22].mxu1 %vm60_vm2, %v51_v50 }
  0x33   :  { %1333 = vmatmul.mubr.msk.f32.gmra.mrb[24].mxu0 %vm60_vm2, %v39_v51  ;;  %1403 = vmatprep.mubr.msk.f32.mxu1 %vm1738_vm1, %v1737_v2 }
  0x34   :  { %1494 = vmatprep.mubr.msk.f32.mxu0 %vm1738_vm1, %v1737_v2 }
  0xd6   :  { %v206_v1 = vpop.f32.mrb[0].mxu0 }
  0xd7   :  { %v207_v3 = vadd.f32 %v2029_v0, %v206_v1  ;;  %v1298_v4 = vpop.f32.mrb[1].mxu0 }
  0xd9   :  { %v330_v6 = vmax.f32 %v207_v3, 0.0  ;;  %v2032_v7 = vpop.f32.mrb[0].mxu1 }
  0xda   :  { %v211_v8 = vpop.f32.mrb[2].mxu0  ;;  %v1337_v9 = vpop.f32.mrb[1].mxu1 }
  0xdb   :  { %v212_v10 = vadd.f32 %v2029_v0, %v211_v8  ;;  %v1301_v11 = vpop.f32.mrb[3].mxu0  ;;  %1404 = vmatmul.mubr.f32.vlgmr.msra.gmra.mrb[24].mxu1 %v330_v6 }
  0xdc   :  { %1406 = vmatprep.mubr.msk.f32.mxu1 %vm1738_vm1, %v1737_v2 }
  0xdd   :  { %v331_v5 = vmax.f32 %v212_v10, 0.0  ;;  %v2037_v12 = vpop.f32.mrb[2].mxu1 }
  0xde   :  { %v216_v13 = vpop.f32.mrb[4].mxu0  ;;  %v1340_v14 = vpop.f32.mrb[3].mxu1 }
  0xdf   :  { %v217_v15 = vadd.f32 %v2029_v0, %v216_v13  ;;  %v1304_v16 = vpop.f32.mrb[5].mxu0  ;;  %1407 = vmatmul.mubr.f32.gmra.mrb[26].mxu1 %v331_v5 }
  0xe0   :  { %1409 = vmatprep.mubr.msk.f32.mxu1 %vm1738_vm1, %v1737_v2 }
  0xe1   :  { %v332_v17 = vmax.f32 %v217_v15, 0.0  ;;  %v2042_v18 = vpop.f32.mrb[4].mxu1 }
  0xe2   :  { %v221_v19 = vpop.f32.mrb[6].mxu0  ;;  %v1343_v20 = vpop.f32.mrb[5].mxu1 }
  0xe3   :  { %v222_v21 = vadd.f32 %v2029_v0, %v221_v19  ;;  %v1307_v22 = vpop.f32.mrb[7].mxu0  ;;  %1410 = vmatmul.mubr.f32.gmra.mrb[28].mxu1 %v332_v17 }
  0xe4   :  { %1412 = vmatprep.mubr.msk.f32.mxu1 %vm1738_vm1, %v1737_v2 }
  0xe5   :  { %v333_v23 = vmax.f32 %v222_v21, 0.0  ;;  %v286_v24 = vpop.f32.mrb[6].mxu1 }
  0xe6   :  { %v226_v25 = vpop.f32.mrb[8].mxu0  ;;  %v2048_v26 = vadd.f32 %v2029_v0, %v286_v24  ;;  %v1346_v27 = vpop.f32.mrb[7].mxu1 }
  0xe7   :  { %v227_v28 = vadd.f32 %v2029_v0, %v226_v25  ;;  %v1310_v29 = vpop.f32.mrb[9].mxu0  ;;  %1413 = vmatmul.mubr.f32.gmra.mrb[30].mxu1 %v333_v23 }
  0xe8   :  { %1415 = vmatprep.mubr.msk.f32.mxu1 %vm1738_vm1, %v1737_v2 }
  0xe9   :  { %v334_v30 = vmax.f32 %v227_v28, 0.0  ;;  %v291_v31 = vpop.f32.mrb[8].mxu1  ;;  %v272_v28 = vadd.f32 %v2029_v0, %v2032_v7 }
  0xea   :  { %v231_v32 = vpop.f32.mrb[10].mxu0  ;;  %v2054_v33 = vadd.f32 %v2029_v0, %v291_v31  ;;  %v1349_v34 = vpop.f32.mrb[9].mxu1  ;;  %v277_v31 = vadd.f32 %v2029_v0, %v2037_v12 }
  0xeb   :  { %v232_v35 = vadd.f32 %v2029_v0, %v231_v32  ;;  %v1313_v36 = vpop.f32.mrb[11].mxu0  ;;  %1416 = vmatmul.mubr.f32.gmra.mrb[32].mxu1 %v334_v30  ;;  %v343_v30 = vmax.f32 %v272_v28, 0.0  ;;  %v282_v34 = vadd.f32 %v2029_v0, %v2042_v18 }
  0xec   :  { %1418 = vmatprep.mubr.msk.f32.mxu1 %vm1738_vm1, %v1737_v2  ;;  %v344_v32 = vmax.f32 %v277_v31, 0.0  ;;  %v347_v12 = vmax.f32 %v2054_v33, 0.0 }
  0xed   :  { %v335_v37 = vmax.f32 %v232_v35, 0.0  ;;  %v296_v38 = vpop.f32.mrb[10].mxu1  ;;  %v345_v7 = vmax.f32 %v282_v34, 0.0  ;;  %v346_v35 = vmax.f32 %v2048_v26, 0.0 }
  0xee   :  { %v236_v39 = vpop.f32.mrb[12].mxu0  ;;  %v2060_v40 = vadd.f32 %v2029_v0, %v296_v38  ;;  %v1352_v41 = vpop.f32.mrb[11].mxu1 }
  0xef   :  { %v237_v42 = vadd.f32 %v2029_v0, %v236_v39  ;;  %v1316_v43 = vpop.f32.mrb[13].mxu0  ;;  %1419 = vmatmul.mubr.f32.gmra.mrb[34].mxu1 %v335_v37  ;;  %v2134_v39 = vld [vmem:[%s2480_s4] ss:$0 sm:$0xff] }
  0xf0   :  { %1421 = vmatprep.mubr.msk.f32.mxu1 %vm1738_vm1, %v1737_v2 }
  0xf1   :  { %v336_v44 = vmax.f32 %v237_v42, 0.0  ;;  %v301_v45 = vpop.f32.mrb[12].mxu1 }
  0xf2   :  { %v241_v46 = vpop.f32.mrb[14].mxu0  ;;  %v2066_v47 = vadd.f32 %v2029_v0, %v301_v45  ;;  %v1355_v48 = vpop.f32.mrb[13].mxu1 }
  0xf3   :  { %v242_v49 = vadd.f32 %v2029_v0, %v241_v46  ;;  %v1319_v50 = vpop.f32.mrb[15].mxu0  ;;  %1422 = vmatmul.mubr.f32.gmra.mrb[36].mxu1 %v336_v44 }
  0xf4   :  { %1424 = vmatprep.mubr.msk.f32.mxu1 %vm1738_vm1, %v1737_v2  ;;  %v349_v18 = vmax.f32 %v2066_v47, 0.0 }
  0xf5   :  { %v337_v51 = vmax.f32 %v242_v49, 0.0  ;;  %v306_v52 = vpop.f32.mrb[14].mxu1 }
  0xf6   :  { %v246_v53 = vpop.f32.mrb[16].mxu0  ;;  %v2072_v54 = vadd.f32 %v2029_v0, %v306_v52  ;;  %v1358_v55 = vpop.f32.mrb[15].mxu1 }
  0xf7   :  { %v247_v56 = vadd.f32 %v2029_v0, %v246_v53  ;;  %v1322_v57 = vpop.f32.mrb[17].mxu0  ;;  %1425 = vmatmul.mubr.f32.gmra.mrb[38].mxu1 %v337_v51 }
  0xf8   :  { %1427 = vmatprep.mubr.msk.f32.mxu1 %vm1738_vm1, %v1737_v2  ;;  %v350_v26 = vmax.f32 %v2072_v54, 0.0 }
  0xf9   :  { %v338_v58 = vmax.f32 %v247_v56, 0.0  ;;  %v311_v59 = vpop.f32.mrb[16].mxu1 }
  0xfa   :  { %v251_v60 = vpop.f32.mrb[18].mxu0  ;;  %v2078_v61 = vadd.f32 %v2029_v0, %v311_v59  ;;  %v1361_v62 = vpop.f32.mrb[17].mxu1 }
  0xfb   :  { %v252_v63 = vadd.f32 %v2029_v0, %v251_v60  ;;  %v1325_v1 = vpop.f32.mrb[19].mxu0  ;;  %1428 = vmatmul.mubr.f32.gmra.mrb[40].mxu1 %v338_v58 }
  0xfc   :  { %1430 = vmatprep.mubr.msk.f32.mxu1 %vm1738_vm1, %v1737_v2  ;;  %v351_v33 = vmax.f32 %v2078_v61, 0.0 }
  0xfd   :  { %v339_v3 = vmax.f32 %v252_v63, 0.0  ;;  %v316_v4 = vpop.f32.mrb[18].mxu1 }
  0xfe   :  { %v256_v6 = vpop.f32.mrb[20].mxu0  ;;  %v317_v8 = vadd.f32 %v2029_v0, %v316_v4  ;;  %v1364_v9 = vpop.f32.mrb[19].mxu1 }
  0xff   :  { %v257_v10 = vadd.f32 %v2029_v0, %v256_v6  ;;  %v1328_v11 = vpop.f32.mrb[21].mxu0  ;;  %1431 = vmatmul.mubr.f32.gmra.mrb[42].mxu1 %v339_v3 }
 0x100   :  { %1433 = vmatprep.mubr.msk.f32.mxu1 %vm1738_vm1, %v1737_v2  ;;  %v352_v36 = vmax.f32 %v317_v8, 0.0 }
 0x101   :  { %v340_v5 = vmax.f32 %v257_v10, 0.0  ;;  %v321_v13 = vpop.f32.mrb[20].mxu1 }
 0x102   :  { %v261_v14 = vpop.f32.mrb[22].mxu0  ;;  %v322_v15 = vadd.f32 %v2029_v0, %v321_v13  ;;  %v1367_v16 = vpop.f32.mrb[21].mxu1 }
 0x103   :  { %v262_v17 = vadd.f32 %v2029_v0, %v261_v14  ;;  %v1331_v19 = vpop.f32.mrb[23].mxu0  ;;  %1434 = vmatmul.mubr.f32.gmra.mrb[44].mxu1 %v340_v5 }
 0x104   :  { %1436 = vmatprep.mubr.msk.f32.mxu1 %vm1738_vm1, %v1737_v2  ;;  %v353_v37 = vmax.f32 %v322_v15, 0.0 }
 0x105   :  { %v341_v20 = vmax.f32 %v262_v17, 0.0  ;;  %v326_v21 = vpop.f32.mrb[22].mxu1 }
 0x106   :  { %v266_v22 = vpop.f32.mrb[24].mxu0  ;;  %v327_v23 = vadd.f32 %v2029_v0, %v326_v21  ;;  %v1370_v24 = vpop.f32.mrb[23].mxu1 }
 0x107   :  { %v267_v25 = vadd.f32 %v2029_v0, %v266_v22  ;;  %v1334_v27 = vpop.f32.mrb[25].mxu0  ;;  %1437 = vmatmul.mubr.f32.gmra.mrb[46].mxu1 %v341_v20  ;;  %v348_v0 = vmax.f32 %v2060_v40, 0.0 }
 0x108   :  { %1439 = vmatprep.mubr.msk.f32.mxu1 %vm1738_vm1, %v1737_v2  ;;  %v354_v38 = vmax.f32 %v327_v23, 0.0 }
 0x109   :  { %v342_v29 = vmax.f32 %v267_v25, 0.0 }
 0x10b   :  { %1440 = vmatmul.mubr.f32.gmra.mrb[48].mxu1 %v342_v29 }
 0x10c   :  { %1442 = vmatprep.mubr.msk.f32.mxu1 %vm1738_vm1, %v1737_v2 }
 0x10f   :  { %1443 = vmatmul.mubr.f32.gmra.mrb[50].mxu1 %v343_v30 }
 0x110   :  { %1445 = vmatprep.mubr.msk.f32.mxu1 %vm1738_vm1, %v1737_v2 }
 0x113   :  { %1446 = vmatmul.mubr.f32.gmra.mrb[52].mxu1 %v344_v32 }
 0x114   :  { %1448 = vmatprep.mubr.msk.f32.mxu1 %vm1738_vm1, %v1737_v2 }
 0x117   :  { %1449 = vmatmul.mubr.f32.gmra.mrb[54].mxu1 %v345_v7 }
 0x118   :  { %1451 = vmatprep.mubr.msk.f32.mxu1 %vm1738_vm1, %v1737_v2 }
 0x11b   :  { %1452 = vmatmul.mubr.f32.gmra.mrb[56].mxu1 %v346_v35 }
 0x11c   :  { %1454 = vmatprep.mubr.msk.f32.mxu1 %vm1738_vm1, %v1737_v2 }
 0x11f   :  { %1455 = vmatmul.mubr.f32.gmra.mrb[58].mxu1 %v347_v12 }
 0x120   :  { %1457 = vmatprep.mubr.msk.f32.mxu1 %vm1738_vm1, %v1737_v2 }
 0x123   :  { %1458 = vmatmul.mubr.f32.gmra.mrb[60].mxu1 %v348_v0 }
 0x124   :  { %1460 = vmatprep.mubr.msk.f32.mxu1 %vm1738_vm1, %v1737_v2 }
 0x127   :  { %1461 = vmatmul.mubr.f32.gmra.mrb[62].mxu1 %v349_v18 }
 0x128   :  { %1463 = vmatprep.mubr.msk.f32.mxu1 %vm1738_vm1, %v1737_v2 }
 0x12b   :  { %1464 = vmatmul.mubr.f32.gmra.mrb[64].mxu1 %v350_v26 }
 0x12c   :  { %1466 = vmatprep.mubr.msk.f32.mxu1 %vm1738_vm1, %v1737_v2 }
 0x12f   :  { %1467 = vmatmul.mubr.f32.gmra.mrb[66].mxu1 %v351_v33 }
 0x130   :  { %1469 = vmatprep.mubr.msk.f32.mxu1 %vm1738_vm1, %v1737_v2 }
 0x133   :  { %1470 = vmatmul.mubr.f32.gmra.mrb[68].mxu1 %v352_v36 }
 0x134   :  { %1472 = vmatprep.mubr.msk.f32.mxu1 %vm1738_vm1, %v1737_v2 }
 0x137   :  { %1473 = vmatmul.mubr.f32.gmra.mrb[70].mxu1 %v353_v37 }
 0x138   :  { %1475 = vmatprep.mubr.msk.f32.mxu1 %vm1738_vm1, %v1737_v2 }
 0x13b   :  { %1476 = vmatmul.mubr.f32.gmra.mrb[72].mxu1 %v354_v38 }
 0x1ae   :  { %v444_v40 = vpop.f32.mrb[24].mxu1 }
 0x1af   :  { %v445_v41 = vadd.f32 %v2134_v39, %v444_v40  ;;  %v1405_v42 = vpop.f32.mrb[25].mxu1 }
 0x1b1   :  { %v568_v43 = vmax.f32 %v445_v41, 0.0 }
 0x1b2   :  { %v449_v44 = vpop.f32.mrb[26].mxu1 }
 0x1b3   :  { %v450_v45 = vadd.f32 %v2134_v39, %v449_v44  ;;  %v1408_v46 = vpop.f32.mrb[27].mxu1  ;;  %1495 = vmatmul.mubr.msk.f32.vlgmr.msra.gmra.mrb[26].mxu0 %vm608_vm3, %v568_v43 }
 0x1b4   :  { %1497 = vmatprep.mubr.msk.f32.mxu0 %vm1738_vm1, %v1737_v2 }
 0x1b5   :  { %v569_v47 = vmax.f32 %v450_v45, 0.0 }
 0x1b6   :  { %v454_v48 = vpop.f32.mrb[28].mxu1 }
 0x1b7   :  { %v455_v49 = vadd.f32 %v2134_v39, %v454_v48  ;;  %v1411_v50 = vpop.f32.mrb[29].mxu1  ;;  %1498 = vmatmul.mubr.msk.f32.gmra.mrb[28].mxu0 %vm608_vm3, %v569_v47 }
 0x1b8   :  { %1500 = vmatprep.mubr.msk.f32.mxu0 %vm1738_vm1, %v1737_v2 }
 0x1b9   :  { %v570_v51 = vmax.f32 %v455_v49, 0.0 }
 0x1ba   :  { %v459_v52 = vpop.f32.mrb[30].mxu1 }
 0x1bb   :  { %v460_v53 = vadd.f32 %v2134_v39, %v459_v52  ;;  %v1414_v54 = vpop.f32.mrb[31].mxu1  ;;  %1501 = vmatmul.mubr.msk.f32.gmra.mrb[30].mxu0 %vm608_vm3, %v570_v51 }
 0x1bc   :  { %1503 = vmatprep.mubr.msk.f32.mxu0 %vm1738_vm1, %v1737_v2 }
 0x1bd   :  { %v571_v55 = vmax.f32 %v460_v53, 0.0 }
 0x1be   :  { %v464_v56 = vpop.f32.mrb[32].mxu1 }
 0x1bf   :  { %v465_v57 = vadd.f32 %v2134_v39, %v464_v56  ;;  %v1417_v58 = vpop.f32.mrb[33].mxu1  ;;  %1504 = vmatmul.mubr.msk.f32.gmra.mrb[32].mxu0 %vm608_vm3, %v571_v55 }
 0x1c0   :  { %1506 = vmatprep.mubr.msk.f32.mxu0 %vm1738_vm1, %v1737_v2 }
 0x1c1   :  { %v572_v59 = vmax.f32 %v465_v57, 0.0 }
 0x1c2   :  { %v469_v60 = vpop.f32.mrb[34].mxu1 }
 0x1c3   :  { %v470_v61 = vadd.f32 %v2134_v39, %v469_v60  ;;  %v1420_v62 = vpop.f32.mrb[35].mxu1  ;;  %1507 = vmatmul.mubr.msk.f32.gmra.mrb[34].mxu0 %vm608_vm3, %v572_v59 }
 0x1c4   :  { %1509 = vmatprep.mubr.msk.f32.mxu0 %vm1738_vm1, %v1737_v2 }
 0x1c5   :  { %v573_v63 = vmax.f32 %v470_v61, 0.0 }
 0x1c6   :  { %v474_v1 = vpop.f32.mrb[36].mxu1 }
 0x1c7   :  { %v475_v3 = vadd.f32 %v2134_v39, %v474_v1  ;;  %v1423_v4 = vpop.f32.mrb[37].mxu1  ;;  %1510 = vmatmul.mubr.msk.f32.gmra.mrb[36].mxu0 %vm608_vm3, %v573_v63 }
 0x1c8   :  { %1512 = vmatprep.mubr.msk.f32.mxu0 %vm1738_vm1, %v1737_v2 }
 0x1c9   :  { %v574_v6 = vmax.f32 %v475_v3, 0.0 }
 0x1ca   :  { %v479_v8 = vpop.f32.mrb[38].mxu1 }
 0x1cb   :  { %v480_v9 = vadd.f32 %v2134_v39, %v479_v8  ;;  %v1426_v10 = vpop.f32.mrb[39].mxu1  ;;  %1513 = vmatmul.mubr.msk.f32.gmra.mrb[38].mxu0 %vm608_vm3, %v574_v6 }
 0x1cc   :  { %1515 = vmatprep.mubr.msk.f32.mxu0 %vm1738_vm1, %v1737_v2 }
 0x1cd   :  { %v575_v11 = vmax.f32 %v480_v9, 0.0 }
 0x1ce   :  { %v484_v5 = vpop.f32.mrb[40].mxu1 }
 0x1cf   :  { %v485_v13 = vadd.f32 %v2134_v39, %v484_v5  ;;  %v1429_v14 = vpop.f32.mrb[41].mxu1  ;;  %1516 = vmatmul.mubr.msk.f32.gmra.mrb[40].mxu0 %vm608_vm3, %v575_v11 }
 0x1d0   :  { %1518 = vmatprep.mubr.msk.f32.mxu0 %vm1738_vm1, %v1737_v2 }
 0x1d1   :  { %v576_v15 = vmax.f32 %v485_v13, 0.0 }
 0x1d2   :  { %v489_v16 = vpop.f32.mrb[42].mxu1 }
 0x1d3   :  { %v490_v17 = vadd.f32 %v2134_v39, %v489_v16  ;;  %v1432_v19 = vpop.f32.mrb[43].mxu1  ;;  %1519 = vmatmul.mubr.msk.f32.gmra.mrb[42].mxu0 %vm608_vm3, %v576_v15 }
 0x1d4   :  { %1521 = vmatprep.mubr.msk.f32.mxu0 %vm1738_vm1, %v1737_v2  ;;  %v2237_v19 = vld [vmem:[%s2482_s6] ss:$0 sm:$0xff]  ;;  %s1740_s6 = smov [#allocation2]  }
 0x1d5   :  { %v577_v20 = vmax.f32 %v490_v17, 0.0  ;;  %s1129_s1 = sshll.u32 %s1740_s6, 4  ;;  %s1130_s1 = int_to_ptr.vmem [resolvable:$true] %s1129_s1 }
 0x1d6   :  { %v494_v21 = vpop.f32.mrb[44].mxu1  ;;  %s1713_s28 = scalar_lea.vmem %s1130_s1, 3200  ;;  %p1718_p1 = scmp.lt.s32.totalorder %s1130_s1, %s1130_s1 }
 0x1d7   :  { %v495_v22 = vadd.f32 %v2134_v39, %v494_v21  ;;  %v1435_v23 = vpop.f32.mrb[45].mxu1  ;;  %1522 = vmatmul.mubr.msk.f32.gmra.mrb[44].mxu0 %vm608_vm3, %v577_v20  ;;  %p1714_p0 = scmp.ne.s32.totalorder %s1130_s1, %s1713_s28  ;;  %p1719_p2 = scmp.lt.s32.totalorder %s1713_s28, %s1713_s28 }
 0x1d8   :  { %1524 = vmatprep.mubr.msk.f32.mxu0 %vm1738_vm1, %v1737_v2 }
 0x1d9   :  { %v578_v24 = vmax.f32 %v495_v22, 0.0  ;;  %p1720_p3 = por %p1719_p2, %p1718_p1 }
 0x1da   :  { %v499_v25 = vpop.f32.mrb[46].mxu1 }
 0x1db   :  { %v500_v27 = vadd.f32 %v2134_v39, %v499_v25  ;;  %v1438_v28 = vpop.f32.mrb[47].mxu1  ;;  %1525 = vmatmul.mubr.msk.f32.gmra.mrb[46].mxu0 %vm608_vm3, %v578_v24  ;;  %p1721_p4 = pnand %p1720_p3, %p1714_p0 }
 0x1dc   :  { %1527 = vmatprep.mubr.msk.f32.mxu0 %vm1738_vm1, %v1737_v2 }
 0x1dd   :  { %v579_v29 = vmax.f32 %v500_v27, 0.0 }
 0x1de   :  { %v504_v30 = vpop.f32.mrb[48].mxu1 }
 0x1df   :  { %v505_v31 = vadd.f32 %v2134_v39, %v504_v30  ;;  %v1441_v32 = vpop.f32.mrb[49].mxu1  ;;  %1528 = vmatmul.mubr.msk.f32.gmra.mrb[48].mxu0 %vm608_vm3, %v579_v29 }
 0x1e0   :  { %1530 = vmatprep.mubr.msk.f32.mxu0 %vm1738_vm1, %v1737_v2 }
 0x1e1   :  { %v580_v34 = vmax.f32 %v505_v31, 0.0 }
 0x1e2   :  { %v509_v7 = vpop.f32.mrb[50].mxu1 }
 0x1e3   :  { %v510_v35 = vadd.f32 %v2134_v39, %v509_v7  ;;  %v1444_v12 = vpop.f32.mrb[51].mxu1  ;;  %1531 = vmatmul.mubr.msk.f32.gmra.mrb[50].mxu0 %vm608_vm3, %v580_v34 }
 0x1e4   :  { %1533 = vmatprep.mubr.msk.f32.mxu0 %vm1738_vm1, %v1737_v2 }
 0x1e5   :  { %v581_v0 = vmax.f32 %v510_v35, 0.0 }
 0x1e6   :  { %v514_v18 = vpop.f32.mrb[52].mxu1 }
 0x1e7   :  { %v515_v26 = vadd.f32 %v2134_v39, %v514_v18  ;;  %v1447_v33 = vpop.f32.mrb[53].mxu1  ;;  %1534 = vmatmul.mubr.msk.f32.gmra.mrb[52].mxu0 %vm608_vm3, %v581_v0 }
 0x1e8   :  { %1536 = vmatprep.mubr.msk.f32.mxu0 %vm1738_vm1, %v1737_v2 }
 0x1e9   :  { %v582_v36 = vmax.f32 %v515_v26, 0.0 }
 0x1ea   :  { %v519_v37 = vpop.f32.mrb[54].mxu1 }
 0x1eb   :  { %v520_v38 = vadd.f32 %v2134_v39, %v519_v37  ;;  %v1450_v40 = vpop.f32.mrb[55].mxu1  ;;  %1537 = vmatmul.mubr.msk.f32.gmra.mrb[54].mxu0 %vm608_vm3, %v582_v36 }
 0x1ec   :  { %1539 = vmatprep.mubr.msk.f32.mxu0 %vm1738_vm1, %v1737_v2 }
 0x1ed   :  { %v583_v41 = vmax.f32 %v520_v38, 0.0 }
 0x1ee   :  { %v524_v42 = vpop.f32.mrb[56].mxu1 }
 0x1ef   :  { %v525_v43 = vadd.f32 %v2134_v39, %v524_v42  ;;  %v1453_v44 = vpop.f32.mrb[57].mxu1  ;;  %1540 = vmatmul.mubr.msk.f32.gmra.mrb[56].mxu0 %vm608_vm3, %v583_v41 }
 0x1f0   :  { %1542 = vmatprep.mubr.msk.f32.mxu0 %vm1738_vm1, %v1737_v2 }
 0x1f1   :  { %v584_v45 = vmax.f32 %v525_v43, 0.0 }
 0x1f2   :  { %v529_v46 = vpop.f32.mrb[58].mxu1 }
 0x1f3   :  { %v530_v47 = vadd.f32 %v2134_v39, %v529_v46  ;;  %v1456_v48 = vpop.f32.mrb[59].mxu1  ;;  %1543 = vmatmul.mubr.msk.f32.gmra.mrb[58].mxu0 %vm608_vm3, %v584_v45 }
 0x1f4   :  { %1545 = vmatprep.mubr.msk.f32.mxu0 %vm1738_vm1, %v1737_v2 }
 0x1f5   :  { %v585_v49 = vmax.f32 %v530_v47, 0.0 }
 0x1f6   :  { %v534_v50 = vpop.f32.mrb[60].mxu1 }
 0x1f7   :  { %v535_v51 = vadd.f32 %v2134_v39, %v534_v50  ;;  %v1459_v52 = vpop.f32.mrb[61].mxu1  ;;  %1546 = vmatmul.mubr.msk.f32.gmra.mrb[60].mxu0 %vm608_vm3, %v585_v49 }
 0x1f8   :  { %1548 = vmatprep.mubr.msk.f32.mxu0 %vm1738_vm1, %v1737_v2 }
 0x1f9   :  { %v586_v53 = vmax.f32 %v535_v51, 0.0 }
 0x1fa   :  { %v539_v54 = vpop.f32.mrb[62].mxu1 }
 0x1fb   :  { %v540_v55 = vadd.f32 %v2134_v39, %v539_v54  ;;  %v1462_v56 = vpop.f32.mrb[63].mxu1  ;;  %1549 = vmatmul.mubr.msk.f32.gmra.mrb[62].mxu0 %vm608_vm3, %v586_v53 }
 0x1fc   :  { %1551 = vmatprep.mubr.msk.f32.mxu0 %vm1738_vm1, %v1737_v2 }
 0x1fd   :  { %v587_v57 = vmax.f32 %v540_v55, 0.0 }
 0x1fe   :  { %v544_v58 = vpop.f32.mrb[64].mxu1 }
 0x1ff   :  { %v545_v59 = vadd.f32 %v2134_v39, %v544_v58  ;;  %v1465_v60 = vpop.f32.mrb[65].mxu1  ;;  %1552 = vmatmul.mubr.msk.f32.gmra.mrb[64].mxu0 %vm608_vm3, %v587_v57 }
 0x200   :  { %1554 = vmatprep.mubr.msk.f32.mxu0 %vm1738_vm1, %v1737_v2 }
 0x201   :  { %v588_v61 = vmax.f32 %v545_v59, 0.0 }
 0x202   :  { %v549_v62 = vpop.f32.mrb[66].mxu1 }
 0x203   :  { %v550_v63 = vadd.f32 %v2134_v39, %v549_v62  ;;  %v1468_v1 = vpop.f32.mrb[67].mxu1  ;;  %1555 = vmatmul.mubr.msk.f32.gmra.mrb[66].mxu0 %vm608_vm3, %v588_v61 }
 0x204   :  { %1557 = vmatprep.mubr.msk.f32.mxu0 %vm1738_vm1, %v1737_v2 }
 0x205   :  { %v589_v3 = vmax.f32 %v550_v63, 0.0 }
 0x206   :  { %v554_v4 = vpop.f32.mrb[68].mxu1 }
 0x207   :  { %v555_v6 = vadd.f32 %v2134_v39, %v554_v4  ;;  %v1471_v8 = vpop.f32.mrb[69].mxu1  ;;  %1558 = vmatmul.mubr.msk.f32.gmra.mrb[68].mxu0 %vm608_vm3, %v589_v3 }
 0x208   :  { %1560 = vmatprep.mubr.msk.f32.mxu0 %vm1738_vm1, %v1737_v2 }
 0x209   :  { %v590_v9 = vmax.f32 %v555_v6, 0.0 }
 0x20a   :  { %v559_v10 = vpop.f32.mrb[70].mxu1 }
 0x20b   :  { %v560_v11 = vadd.f32 %v2134_v39, %v559_v10  ;;  %v1474_v5 = vpop.f32.mrb[71].mxu1  ;;  %1561 = vmatmul.mubr.msk.f32.gmra.mrb[70].mxu0 %vm608_vm3, %v590_v9 }
 0x20c   :  { %1563 = vmatprep.mubr.msk.f32.mxu0 %vm1738_vm1, %v1737_v2 }
 0x20d   :  { %v591_v13 = vmax.f32 %v560_v11, 0.0 }
 0x20e   :  { %v564_v14 = vpop.f32.mrb[72].mxu1 }
 0x20f   :  { %v565_v15 = vadd.f32 %v2134_v39, %v564_v14  ;;  %v1477_v16 = vpop.f32.mrb[73].mxu1  ;;  %1564 = vmatmul.mubr.msk.f32.gmra.mrb[72].mxu0 %vm608_vm3, %v591_v13 }
 0x210   :  { %1566 = vmatprep.mubr.msk.f32.mxu0 %vm1738_vm1, %v1737_v2 }
 0x211   :  { %v592_v17 = vmax.f32 %v565_v15, 0.0 }
 0x213   :  { %1567 = vmatmul.mubr.msk.f32.gmra.mrb[74].mxu0 %vm608_vm3, %v592_v17 }
 0x286   :  { %v750_v20 = vpop.f32.mrb[26].mxu0 }
 0x287   :  { %v2240_v21 = vadd.f32 %v2237_v19, %v750_v20  ;;  %v1496_v22 = vpop.f32.mrb[27].mxu0 }
 0x289   :  { %874 = vmax.xlane.f32.xlu0 %v2240_v21 }
 0x28a   :  { %v755_v39 = vpop.f32.mrb[28].mxu0 }
 0x28b   :  { %v2244_v23 = vadd.f32 %v2237_v19, %v755_v39  ;;  %v1499_v2 = vpop.f32.mrb[29].mxu0 }
 0x28d   :  { %876 = vmax.xlane.f32.xlu0 %v2244_v23 }
 0x28e   :  { %v760_v24 = vpop.f32.mrb[30].mxu0 }
 0x28f   :  { %v2248_v25 = vadd.f32 %v2237_v19, %v760_v24  ;;  %v1502_v27 = vpop.f32.mrb[31].mxu0 }
 0x291   :  { %878 = vmax.xlane.f32.xlu1 %v2248_v25 }
 0x292   :  { %v765_v28 = vpop.f32.mrb[32].mxu0 }
 0x293   :  { %v2252_v29 = vadd.f32 %v2237_v19, %v765_v28  ;;  %v1505_v30 = vpop.f32.mrb[33].mxu0 }
 0x295   :  { %880 = vmax.xlane.f32.xlu1 %v2252_v29 }
 0x296   :  { %v770_v31 = vpop.f32.mrb[34].mxu0 }
 0x297   :  { %v2256_v32 = vadd.f32 %v2237_v19, %v770_v31  ;;  %v1508_v34 = vpop.f32.mrb[35].mxu0 }
 0x299   :  { %882 = vmax.xlane.f32.xlu0 %v2256_v32 }
 0x29a   :  { %v775_v7 = vpop.f32.mrb[36].mxu0 }
 0x29b   :  { %v2260_v35 = vadd.f32 %v2237_v19, %v775_v7  ;;  %v1511_v12 = vpop.f32.mrb[37].mxu0 }
 0x29d   :  { %884 = vmax.xlane.f32.xlu1 %v2260_v35 }
 0x29e   :  { %v780_v0 = vpop.f32.mrb[38].mxu0 }
 0x29f   :  { %v2264_v18 = vadd.f32 %v2237_v19, %v780_v0  ;;  %v1514_v26 = vpop.f32.mrb[39].mxu0 }
 0x2a1   :  { %886 = vmax.xlane.f32.xlu0 %v2264_v18 }
 0x2a2   :  { %v785_v33 = vpop.f32.mrb[40].mxu0 }
 0x2a3   :  { %v2268_v36 = vadd.f32 %v2237_v19, %v785_v33  ;;  %v1517_v37 = vpop.f32.mrb[41].mxu0 }
 0x2a5   :  { %888 = vmax.xlane.f32.xlu1 %v2268_v36 }
 0x2a6   :  { %v790_v38 = vpop.f32.mrb[42].mxu0 }
 0x2a7   :  { %v2272_v40 = vadd.f32 %v2237_v19, %v790_v38  ;;  %v1520_v41 = vpop.f32.mrb[43].mxu0 }
 0x2a9   :  { %890 = vmax.xlane.f32.xlu0 %v2272_v40 }
 0x2aa   :  { %v795_v42 = vpop.f32.mrb[44].mxu0 }
 0x2ab   :  { %v2276_v43 = vadd.f32 %v2237_v19, %v795_v42  ;;  %v1523_v44 = vpop.f32.mrb[45].mxu0 }
 0x2ad   :  { %892 = vmax.xlane.f32.xlu1 %v2276_v43 }
 0x2ae   :  { %v800_v45 = vpop.f32.mrb[46].mxu0 }
 0x2af   :  { %v2280_v46 = vadd.f32 %v2237_v19, %v800_v45  ;;  %v1526_v47 = vpop.f32.mrb[47].mxu0 }
 0x2b1   :  { %894 = vmax.xlane.f32.xlu0 %v2280_v46 }
 0x2b2   :  { %v805_v48 = vpop.f32.mrb[48].mxu0 }
 0x2b3   :  { %v2284_v49 = vadd.f32 %v2237_v19, %v805_v48  ;;  %v1529_v50 = vpop.f32.mrb[49].mxu0 }
 0x2b5   :  { %896 = vmax.xlane.f32.xlu1 %v2284_v49 }
 0x2b6   :  { %v810_v51 = vpop.f32.mrb[50].mxu0 }
 0x2b7   :  { %v2288_v52 = vadd.f32 %v2237_v19, %v810_v51  ;;  %v1532_v53 = vpop.f32.mrb[51].mxu0 }
 0x2b9   :  { %898 = vmax.xlane.f32.xlu0 %v2288_v52 }
 0x2ba   :  { %v815_v54 = vpop.f32.mrb[52].mxu0 }
 0x2bb   :  { %v2292_v55 = vadd.f32 %v2237_v19, %v815_v54  ;;  %v1535_v56 = vpop.f32.mrb[53].mxu0 }
 0x2bd   :  { %900 = vmax.xlane.f32.xlu1 %v2292_v55 }
 0x2be   :  { %v820_v57 = vpop.f32.mrb[54].mxu0 }
 0x2bf   :  { %v2296_v58 = vadd.f32 %v2237_v19, %v820_v57  ;;  %v1538_v59 = vpop.f32.mrb[55].mxu0 }
 0x2c1   :  { %902 = vmax.xlane.f32.xlu0 %v2296_v58 }
 0x2c2   :  { %v825_v60 = vpop.f32.mrb[56].mxu0 }
 0x2c3   :  { %v2300_v61 = vadd.f32 %v2237_v19, %v825_v60  ;;  %v1541_v62 = vpop.f32.mrb[57].mxu0 }
 0x2c5   :  { %904 = vmax.xlane.f32.xlu1 %v2300_v61 }
 0x2c6   :  { %v830_v63 = vpop.f32.mrb[58].mxu0 }
 0x2c7   :  { %v2304_v1 = vadd.f32 %v2237_v19, %v830_v63  ;;  %v1544_v3 = vpop.f32.mrb[59].mxu0 }
 0x2c9   :  { %906 = vmax.xlane.f32.xlu0 %v2304_v1 }
 0x2ca   :  { %v835_v4 = vpop.f32.mrb[60].mxu0 }
 0x2cb   :  { %v2308_v6 = vadd.f32 %v2237_v19, %v835_v4  ;;  %v1547_v8 = vpop.f32.mrb[61].mxu0 }
 0x2cd   :  { %908 = vmax.xlane.f32.xlu1 %v2308_v6 }
 0x2ce   :  { %v840_v9 = vpop.f32.mrb[62].mxu0 }
 0x2cf   :  { %v2312_v10 = vadd.f32 %v2237_v19, %v840_v9  ;;  %v1550_v11 = vpop.f32.mrb[63].mxu0 }
 0x2d1   :  { %910 = vmax.xlane.f32.xlu0 %v2312_v10 }
 0x2d2   :  { %v845_v5 = vpop.f32.mrb[64].mxu0 }
 0x2d3   :  { %v2316_v13 = vadd.f32 %v2237_v19, %v845_v5  ;;  %v1553_v14 = vpop.f32.mrb[65].mxu0 }
 0x2d5   :  { %912 = vmax.xlane.f32.xlu1 %v2316_v13 }
 0x2d6   :  { %v850_v15 = vpop.f32.mrb[66].mxu0 }
 0x2d7   :  { %v2320_v16 = vadd.f32 %v2237_v19, %v850_v15  ;;  %v1556_v17 = vpop.f32.mrb[67].mxu0 }
 0x2d9   :  { %914 = vmax.xlane.f32.xlu0 %v2320_v16 }
 0x2da   :  { %v855_v20 = vpop.f32.mrb[68].mxu0 }
 0x2db   :  { %v2324_v22 = vadd.f32 %v2237_v19, %v855_v20  ;;  %v1559_v39 = vpop.f32.mrb[69].mxu0 }
 0x2dd   :  { %916 = vmax.xlane.f32.xlu1 %v2324_v22 }
 0x2de   :  { %v860_v2 = vpop.f32.mrb[70].mxu0 }
 0x2df   :  { %v2328_v24 = vadd.f32 %v2237_v19, %v860_v2  ;;  %v1562_v27 = vpop.f32.mrb[71].mxu0 }
 0x2e1   :  { %918 = vmax.xlane.f32.xlu0 %v2328_v24 }
 0x2e2   :  { %v865_v28 = vpop.f32.mrb[72].mxu0 }
 0x2e3   :  { %v2332_v30 = vadd.f32 %v2237_v19, %v865_v28  ;;  %v1565_v31 = vpop.f32.mrb[73].mxu0 }
 0x2e5   :  { %920 = vmax.xlane.f32.xlu1 %v2332_v30 }
 0x2e6   :  { %v870_v34 = vpop.f32.mrb[74].mxu0 }
 0x2e7   :  { %v2336_v7 = vadd.f32 %v2237_v19, %v870_v34  ;;  %v1568_v12 = vpop.f32.mrb[75].mxu0 }
 0x2e9   :  { %922 = vmax.xlane.f32.xlu0 %v2336_v7 }
 0x316   :  { %v875_v0 = vpop.xlane.xlu0 %874 }
 0x317   :  { %v924_v26 = vsub.f32 %v2240_v21, %v875_v0 }
 0x319   :  { %v949_v33 = vmul.f32 1.442695, %v924_v26 }
 0x31a   :  { %v877_v37 = vpop.xlane.xlu0 %876 }
 0x31b   :  { %1613 = vpow2.f32 %v949_v33  ;;  %v925_v38 = vsub.f32 %v2244_v23, %v877_v37 }
 0x31d   :  { %v951_v41 = vmul.f32 1.442695, %v925_v38 }
 0x31e   :  { %v879_v42 = vpop.xlane.xlu1 %878 }
 0x31f   :  { %1615 = vpow2.f32 %v951_v41  ;;  %v926_v44 = vsub.f32 %v2248_v25, %v879_v42 }
 0x321   :  { %v953_v45 = vmul.f32 1.442695, %v926_v44 }
 0x322   :  { %v881_v47 = vpop.xlane.xlu1 %880 }
 0x323   :  { %1617 = vpow2.f32 %v953_v45  ;;  %v927_v19 = vsub.f32 %v2252_v29, %v881_v47 }
 0x325   :  { %v2343_v48 = vpop.eup %1613  ;;  %v955_v50 = vmul.f32 1.442695, %v927_v19 }
 0x326   :  { %v883_v51 = vpop.xlane.xlu0 %882  ;;  %999 = vadd.xlane.f32.xlu1 %v2343_v48 }
 0x327   :  { %1619 = vpow2.f32 %v955_v50  ;;  %v928_v21 = vsub.f32 %v2256_v32, %v883_v51 }
 0x329   :  { %v2347_v23 = vpop.eup %1615  ;;  %v957_v53 = vmul.f32 1.442695, %v928_v21 }
 0x32a   :  { %v885_v54 = vpop.xlane.xlu1 %884  ;;  %1001 = vadd.xlane.f32.xlu0 %v2347_v23 }
 0x32b   :  { %1621 = vpow2.f32 %v957_v53  ;;  %v929_v25 = vsub.f32 %v2260_v35, %v885_v54 }
 0x32d   :  { %v2351_v56 = vpop.eup %1617  ;;  %v959_v29 = vmul.f32 1.442695, %v929_v25 }
 0x32e   :  { %v887_v57 = vpop.xlane.xlu0 %886  ;;  %1003 = vadd.xlane.f32.xlu1 %v2351_v56 }
 0x32f   :  { %1623 = vpow2.f32 %v959_v29  ;;  %v930_v59 = vsub.f32 %v2264_v18, %v887_v57 }
 0x331   :  { %v2355_v60 = vpop.eup %1619  ;;  %v961_v32 = vmul.f32 1.442695, %v930_v59 }
 0x332   :  { %v889_v62 = vpop.xlane.xlu1 %888  ;;  %1005 = vadd.xlane.f32.xlu0 %v2355_v60 }
 0x333   :  { %1625 = vpow2.f32 %v961_v32  ;;  %v931_v63 = vsub.f32 %v2268_v36, %v889_v62 }
 0x335   :  { %v2359_v3 = vpop.eup %1621  ;;  %v963_v35 = vmul.f32 1.442695, %v931_v63 }
 0x336   :  { %v891_v4 = vpop.xlane.xlu0 %890  ;;  %1007 = vadd.xlane.f32.xlu1 %v2359_v3 }
 0x337   :  { %1627 = vpow2.f32 %v963_v35  ;;  %v932_v8 = vsub.f32 %v2272_v40, %v891_v4 }
 0x339   :  { %v2363_v9 = vpop.eup %1623  ;;  %v965_v18 = vmul.f32 1.442695, %v932_v8 }
 0x33a   :  { %v893_v11 = vpop.xlane.xlu1 %892  ;;  %1009 = vadd.xlane.f32.xlu0 %v2363_v9 }
 0x33b   :  { %1629 = vpow2.f32 %v965_v18  ;;  %v933_v5 = vsub.f32 %v2276_v43, %v893_v11 }
 0x33d   :  { %v2367_v14 = vpop.eup %1625  ;;  %v967_v36 = vmul.f32 1.442695, %v933_v5 }
 0x33e   :  { %v895_v15 = vpop.xlane.xlu0 %894  ;;  %1011 = vadd.xlane.f32.xlu1 %v2367_v14 }
 0x33f   :  { %1631 = vpow2.f32 %v967_v36  ;;  %v934_v17 = vsub.f32 %v2280_v46, %v895_v15 }
 0x341   :  { %v2371_v20 = vpop.eup %1627  ;;  %v969_v40 = vmul.f32 1.442695, %v934_v17 }
 0x342   :  { %v897_v39 = vpop.xlane.xlu1 %896  ;;  %1013 = vadd.xlane.f32.xlu0 %v2371_v20 }
 0x343   :  { %1633 = vpow2.f32 %v969_v40  ;;  %v935_v2 = vsub.f32 %v2284_v49, %v897_v39 }
 0x345   :  { %v2375_v27 = vpop.eup %1629  ;;  %v971_v43 = vmul.f32 1.442695, %v935_v2 }
 0x346   :  { %v899_v28 = vpop.xlane.xlu0 %898  ;;  %1015 = vadd.xlane.f32.xlu1 %v2375_v27 }
 0x347   :  { %1635 = vpow2.f32 %v971_v43  ;;  %v936_v31 = vsub.f32 %v2288_v52, %v899_v28 }
 0x349   :  { %v2379_v34 = vpop.eup %1631  ;;  %v973_v46 = vmul.f32 1.442695, %v936_v31 }
 0x34a   :  { %v901_v12 = vpop.xlane.xlu1 %900  ;;  %1017 = vadd.xlane.f32.xlu0 %v2379_v34 }
 0x34b   :  { %1637 = vpow2.f32 %v973_v46  ;;  %v937_v0 = vsub.f32 %v2292_v55, %v901_v12 }
 0x34d   :  { %v2383_v26 = vpop.eup %1633  ;;  %v975_v49 = vmul.f32 1.442695, %v937_v0 }
 0x34e   :  { %v903_v33 = vpop.xlane.xlu0 %902  ;;  %1019 = vadd.xlane.f32.xlu1 %v2383_v26 }
 0x34f   :  { %1639 = vpow2.f32 %v975_v49  ;;  %v938_v37 = vsub.f32 %v2296_v58, %v903_v33 }
 0x351   :  { %v2387_v38 = vpop.eup %1635  ;;  %v977_v52 = vmul.f32 1.442695, %v938_v37 }
 0x352   :  { %v905_v41 = vpop.xlane.xlu1 %904  ;;  %1021 = vadd.xlane.f32.xlu0 %v2387_v38 }
 0x353   :  { %1641 = vpow2.f32 %v977_v52  ;;  %v939_v42 = vsub.f32 %v2300_v61, %v905_v41 }
 0x355   :  { %v2391_v44 = vpop.eup %1637  ;;  %v979_v55 = vmul.f32 1.442695, %v939_v42 }
 0x356   :  { %v907_v45 = vpop.xlane.xlu0 %906  ;;  %1023 = vadd.xlane.f32.xlu1 %v2391_v44 }
 0x357   :  { %1643 = vpow2.f32 %v979_v55  ;;  %v940_v47 = vsub.f32 %v2304_v1, %v907_v45 }
 0x359   :  { %v2395_v19 = vpop.eup %1639  ;;  %v981_v58 = vmul.f32 1.442695, %v940_v47 }
 0x35a   :  { %v909_v50 = vpop.xlane.xlu1 %908  ;;  %1025 = vadd.xlane.f32.xlu0 %v2395_v19 }
 0x35b   :  { %1645 = vpow2.f32 %v981_v58  ;;  %v941_v51 = vsub.f32 %v2308_v6, %v909_v50 }
 0x35d   :  { %v2399_v21 = vpop.eup %1641  ;;  %v983_v61 = vmul.f32 1.442695, %v941_v51 }
 0x35e   :  { %v911_v53 = vpop.xlane.xlu0 %910  ;;  %1027 = vadd.xlane.f32.xlu1 %v2399_v21 }
 0x35f   :  { %1647 = vpow2.f32 %v983_v61  ;;  %v942_v54 = vsub.f32 %v2312_v10, %v911_v53 }
 0x361   :  { %v2403_v25 = vpop.eup %1643  ;;  %v985_v1 = vmul.f32 1.442695, %v942_v54 }
 0x362   :  { %v913_v29 = vpop.xlane.xlu1 %912  ;;  %1029 = vadd.xlane.f32.xlu0 %v2403_v25 }
 0x363   :  { %1649 = vpow2.f32 %v985_v1  ;;  %v943_v57 = vsub.f32 %v2316_v13, %v913_v29 }
 0x365   :  { %v2407_v59 = vpop.eup %1645  ;;  %v987_v6 = vmul.f32 1.442695, %v943_v57 }
 0x366   :  { %v915_v32 = vpop.xlane.xlu0 %914  ;;  %1031 = vadd.xlane.f32.xlu1 %v2407_v59 }
 0x367   :  { %1651 = vpow2.f32 %v987_v6  ;;  %v944_v62 = vsub.f32 %v2320_v16, %v915_v32 }
 0x369   :  { %v2411_v63 = vpop.eup %1647  ;;  %v989_v10 = vmul.f32 1.442695, %v944_v62 }
 0x36a   :  { %v917_v35 = vpop.xlane.xlu1 %916  ;;  %1033 = vadd.xlane.f32.xlu0 %v2411_v63 }
 0x36b   :  { %1653 = vpow2.f32 %v989_v10  ;;  %v945_v4 = vsub.f32 %v2324_v22, %v917_v35 }
 0x36d   :  { %v2415_v8 = vpop.eup %1649  ;;  %v991_v13 = vmul.f32 1.442695, %v945_v4 }
 0x36e   :  { %v919_v18 = vpop.xlane.xlu0 %918  ;;  %1035 = vadd.xlane.f32.xlu1 %v2415_v8 }
 0x36f   :  { %1655 = vpow2.f32 %v991_v13  ;;  %v946_v11 = vsub.f32 %v2328_v24, %v919_v18 }
 0x371   :  { %v2419_v5 = vpop.eup %1651  ;;  %v993_v16 = vmul.f32 1.442695, %v946_v11 }
 0x372   :  { %v921_v36 = vpop.xlane.xlu1 %920  ;;  %1037 = vadd.xlane.f32.xlu0 %v2419_v5 }
 0x373   :  { %1657 = vpow2.f32 %v993_v16  ;;  %v947_v15 = vsub.f32 %v2332_v30, %v921_v36 }
 0x375   :  { %v2423_v17 = vpop.eup %1653  ;;  %v995_v22 = vmul.f32 1.442695, %v947_v15 }
 0x376   :  { %1039 = vadd.xlane.f32.xlu1 %v2423_v17  ;;  %v923_v40 = vpop.xlane.xlu0 %922 }
 0x377   :  { %1659 = vpow2.f32 %v995_v22  ;;  %v948_v39 = vsub.f32 %v2336_v7, %v923_v40 }
 0x379   :  { %v2427_v2 = vpop.eup %1655  ;;  %v997_v24 = vmul.f32 1.442695, %v948_v39 }
 0x37a   :  { %1041 = vadd.xlane.f32.xlu0 %v2427_v2 }
 0x37b   :  { %1661 = vpow2.f32 %v997_v24 }
 0x37d   :  { %v2430_v43 = vpop.eup %1657 }
 0x37e   :  { %1043 = vadd.xlane.f32.xlu1 %v2430_v43 }
 0x381   :  { %v2433_v30 = vpop.eup %1659 }
 0x382   :  { %1045 = vadd.xlane.f32.xlu0 %v2433_v30 }
 0x385   :  { %v2436_v28 = vpop.eup %1661 }
 0x386   :  { %1047 = vadd.xlane.f32.xlu1 %v2436_v28 }
 0x3b3   :  { %v1000_v31 = vpop.xlane.xlu1 %999 }
 0x3b4   :  { %1663 = vrcp.f32 %v1000_v31 }
 0x3b7   :  { %v1002_v7 = vpop.xlane.xlu0 %1001 }
 0x3b8   :  { %1665 = vrcp.f32 %v1002_v7 }
 0x3bb   :  { %v1004_v46 = vpop.xlane.xlu1 %1003 }
 0x3bc   :  { %1667 = vrcp.f32 %v1004_v46 }
 0x3be   :  { %v1664_v12 = vpop.eup %1663 }
 0x3bf   :  { %v1050_v0 = vmul.f32 %v1664_v12, %v2343_v48  ;;  %v1006_v49 = vpop.xlane.xlu0 %1005 }
 0x3c0   :  { %1669 = vrcp.f32 %v1006_v49 }
 0x3c1   :  { %1099 = vst [vmem:[#allocation2] sm:$0xff] %v1050_v0 }
 0x3c2   :  { %v1666_v33 = vpop.eup %1665 }
 0x3c3   :  { %v1052_v37 = vmul.f32 %v1666_v33, %v2347_v23  ;;  %v1008_v52 = vpop.xlane.xlu1 %1007 }
 0x3c4   :  { %1671 = vrcp.f32 %v1008_v52 }
 0x3c5   :  { %1100 = vst [vmem:[#allocation2 + $0x8] sm:$0xff] %v1052_v37 }
 0x3c6   :  { %v1668_v41 = vpop.eup %1667 }
 0x3c7   :  { %v1054_v42 = vmul.f32 %v1668_v41, %v2351_v56  ;;  %v1010_v55 = vpop.xlane.xlu0 %1009 }
 0x3c8   :  { %1673 = vrcp.f32 %v1010_v55 }
 0x3c9   :  { %1101 = vst [vmem:[#allocation2 + $0x10] sm:$0xff] %v1054_v42 }
 0x3ca   :  { %v1670_v45 = vpop.eup %1669 }
 0x3cb   :  { %v1056_v47 = vmul.f32 %v1670_v45, %v2355_v60  ;;  %v1012_v58 = vpop.xlane.xlu1 %1011 }
 0x3cc   :  { %1675 = vrcp.f32 %v1012_v58 }
 0x3cd   :  { %1102 = vst [vmem:[#allocation2 + $0x18] sm:$0xff] %v1056_v47 }
 0x3ce   :  { %v1672_v48 = vpop.eup %1671 }
 0x3cf   :  { %v1058_v50 = vmul.f32 %v1672_v48, %v2359_v3  ;;  %v1014_v51 = vpop.xlane.xlu0 %1013 }
 0x3d0   :  { %1677 = vrcp.f32 %v1014_v51 }
 0x3d1   :  { %1103 = vst [vmem:[#allocation2 + $0x20] sm:$0xff] %v1058_v50 }
 0x3d2   :  { %v1674_v23 = vpop.eup %1673 }
 0x3d3   :  { %v1060_v61 = vmul.f32 %v1674_v23, %v2363_v9  ;;  %v1016_v53 = vpop.xlane.xlu1 %1015 }
 0x3d4   :  { %1679 = vrcp.f32 %v1016_v53 }
 0x3d5   :  { %1104 = vst [vmem:[#allocation2 + $0x28] sm:$0xff] %v1060_v61 }
 0x3d6   :  { %v1676_v56 = vpop.eup %1675 }
 0x3d7   :  { %v1062_v54 = vmul.f32 %v1676_v56, %v2367_v14  ;;  %v1018_v1 = vpop.xlane.xlu0 %1017 }
 0x3d8   :  { %1681 = vrcp.f32 %v1018_v1 }
 0x3d9   :  { %1105 = vst [vmem:[#allocation2 + $0x30] sm:$0xff] %v1062_v54 }
 0x3da   :  { %v1678_v60 = vpop.eup %1677 }
 0x3db   :  { %v1064_v29 = vmul.f32 %v1678_v60, %v2371_v20  ;;  %v1020_v57 = vpop.xlane.xlu1 %1019 }
 0x3dc   :  { %1683 = vrcp.f32 %v1020_v57 }
 0x3dd   :  { %1106 = vst [vmem:[#allocation2 + $0x38] sm:$0xff] %v1064_v29 }
 0x3de   :  { %v1680_v3 = vpop.eup %1679 }
 0x3df   :  { %v1066_v6 = vmul.f32 %v1680_v3, %v2375_v27  ;;  %v1022_v32 = vpop.xlane.xlu0 %1021 }
 0x3e0   :  { %1685 = vrcp.f32 %v1022_v32 }
 0x3e1   :  { %1107 = vst [vmem:[#allocation2 + $0x40] sm:$0xff] %v1066_v6 }
 0x3e2   :  { %v1682_v9 = vpop.eup %1681 }
 0x3e3   :  { %v1068_v62 = vmul.f32 %v1682_v9, %v2379_v34  ;;  %v1024_v10 = vpop.xlane.xlu1 %1023 }
 0x3e4   :  { %1687 = vrcp.f32 %v1024_v10 }
 0x3e5   :  { %1108 = vst [vmem:[#allocation2 + $0x48] sm:$0xff] %v1068_v62 }
 0x3e6   :  { %v1684_v14 = vpop.eup %1683 }
 0x3e7   :  { %v1070_v35 = vmul.f32 %v1684_v14, %v2383_v26  ;;  %v1026_v4 = vpop.xlane.xlu0 %1025 }
 0x3e8   :  { %1689 = vrcp.f32 %v1026_v4 }
 0x3e9   :  { %1109 = vst [vmem:[#allocation2 + $0x50] sm:$0xff] %v1070_v35 }
 0x3ea   :  { %v1686_v20 = vpop.eup %1685 }
 0x3eb   :  { %v1072_v13 = vmul.f32 %v1686_v20, %v2387_v38  ;;  %v1028_v18 = vpop.xlane.xlu1 %1027 }
 0x3ec   :  { %1691 = vrcp.f32 %v1028_v18 }
 0x3ed   :  { %1110 = vst [vmem:[#allocation2 + $0x58] sm:$0xff] %v1072_v13 }
 0x3ee   :  { %v1688_v27 = vpop.eup %1687 }
 0x3ef   :  { %v1074_v11 = vmul.f32 %v1688_v27, %v2391_v44  ;;  %v1030_v16 = vpop.xlane.xlu0 %1029 }
 0x3f0   :  { %1693 = vrcp.f32 %v1030_v16 }
 0x3f1   :  { %1111 = vst [vmem:[#allocation2 + $0x60] sm:$0xff] %v1074_v11 }
 0x3f2   :  { %v1690_v34 = vpop.eup %1689 }
 0x3f3   :  { %v1076_v36 = vmul.f32 %v1690_v34, %v2395_v19  ;;  %v1032_v15 = vpop.xlane.xlu1 %1031 }
 0x3f4   :  { %1695 = vrcp.f32 %v1032_v15 }
 0x3f5   :  { %1112 = vst [vmem:[#allocation2 + $0x68] sm:$0xff] %v1076_v36 }
 0x3f6   :  { %v1692_v26 = vpop.eup %1691 }
 0x3f7   :  { %v1078_v22 = vmul.f32 %v1692_v26, %v2399_v21  ;;  %v1034_v40 = vpop.xlane.xlu0 %1033 }
 0x3f8   :  { %1697 = vrcp.f32 %v1034_v40 }
 0x3f9   :  { %1113 = vst [vmem:[#allocation2 + $0x70] sm:$0xff] %v1078_v22 }
 0x3fa   :  { %v1694_v38 = vpop.eup %1693 }
 0x3fb   :  { %v1080_v39 = vmul.f32 %v1694_v38, %v2403_v25  ;;  %v1036_v24 = vpop.xlane.xlu1 %1035 }
 0x3fc   :  { %1699 = vrcp.f32 %v1036_v24 }
 0x3fd   :  { %1114 = vst [vmem:[#allocation2 + $0x78] sm:$0xff] %v1080_v39 }
 0x3fe   :  { %v1696_v44 = vpop.eup %1695 }
 0x3ff   :  { %v1082_v31 = vmul.f32 %v1696_v44, %v2407_v59  ;;  %v1038_v7 = vpop.xlane.xlu0 %1037 }
 0x400   :  { %1701 = vrcp.f32 %v1038_v7 }
 0x401   :  { %1115 = vst [vmem:[#allocation2 + $0x80] sm:$0xff] %v1082_v31 }
 0x402   :  { %v1698_v19 = vpop.eup %1697 }
 0x403   :  { %v1084_v46 = vmul.f32 %v1698_v19, %v2411_v63  ;;  %v1040_v12 = vpop.xlane.xlu1 %1039 }
 0x404   :  { %1703 = vrcp.f32 %v1040_v12 }
 0x405   :  { %1116 = vst [vmem:[#allocation2 + $0x88] sm:$0xff] %v1084_v46 }
 0x406   :  { %v1700_v21 = vpop.eup %1699 }
 0x407   :  { %v1086_v0 = vmul.f32 %v1700_v21, %v2415_v8  ;;  %v1042_v49 = vpop.xlane.xlu0 %1041 }
 0x408   :  { %1705 = vrcp.f32 %v1042_v49 }
 0x409   :  { %1117 = vst [vmem:[#allocation2 + $0x90] sm:$0xff] %v1086_v0 }
 0x40a   :  { %v1702_v25 = vpop.eup %1701 }
 0x40b   :  { %v1088_v33 = vmul.f32 %v1702_v25, %v2419_v5  ;;  %v1044_v37 = vpop.xlane.xlu1 %1043 }
 0x40c   :  { %1707 = vrcp.f32 %v1044_v37 }
 0x40d   :  { %1118 = vst [vmem:[#allocation2 + $0x98] sm:$0xff] %v1088_v33 }
 0x40e   :  { %v1704_v59 = vpop.eup %1703 }
 0x40f   :  { %v1090_v52 = vmul.f32 %v1704_v59, %v2423_v17  ;;  %v1046_v41 = vpop.xlane.xlu0 %1045 }
 0x410   :  { %1709 = vrcp.f32 %v1046_v41 }
 0x411   :  { %1119 = vst [vmem:[#allocation2 + $0xa0] sm:$0xff] %v1090_v52 }
 0x412   :  { %v1706_v63 = vpop.eup %1705 }
 0x413   :  { %v1092_v42 = vmul.f32 %v1706_v63, %v2427_v2  ;;  %v1048_v55 = vpop.xlane.xlu1 %1047 }
 0x414   :  { %1711 = vrcp.f32 %v1048_v55 }
 0x415   :  { %1120 = vst [vmem:[#allocation2 + $0xa8] sm:$0xff] %v1092_v42 }
 0x416   :  { %v1708_v8 = vpop.eup %1707 }
 0x417   :  { %v1094_v45 = vmul.f32 %v1708_v8, %v2430_v43 }
 0x419   :  { %1121 = vst [vmem:[#allocation2 + $0xb0] sm:$0xff] %v1094_v45 }
 0x41a   :  { %v1710_v5 = vpop.eup %1709 }
 0x41b   :  { %v1096_v47 = vmul.f32 %v1710_v5, %v2433_v30 }
 0x41d   :  { %1122 = vst [vmem:[#allocation2 + $0xb8] sm:$0xff] %v1096_v47 }
 0x41e   :  { %v1712_v17 = vpop.eup %1711 }
 0x41f   :  { %v1098_v58 = vmul.f32 %v1712_v17, %v2436_v28 }
 0x421   :  { %1123 = vst [vmem:[#allocation2 + $0xc0] sm:$0xff] %v1098_v58 }
 0x422   :  { %1724 = shalt.err (!%p1721_p4)
}
 0x423   :  { %s1725_s8 = scalar_lea.hbm %s2483_s7, 3200 }
 0x424   :  { %p1726_p5 = scmp.ne.s32.totalorder %s2483_s7, %s1725_s8  ;;  %p1729_p6 = scmp.lt.u32.totalorder %s1725_s8, %s2483_s7 }
 0x426   :  { %p1731_p7 = pnand %p1729_p6, %p1726_p5 }
 0x428   :  { %1734 = shalt.err (!%p1731_p7)
}
 0x429   :  { %s1741_s13 = smov 128   ;;  %s1742_s14 = smov 8  }
 0x42a   :  { %1135 = dma.vmem_to_hbm [thread:$0]  %s1130_s1, 3200, %s2483_s7, [#allocation3], %s1741_s13, %s1741_s13, %s1742_s14  }
 0x42b   :  { %1735 = dma.done.wait [#allocation3], 3200  }
 0x42c   :  { %1736 = vsyncadd [#allocation3], 4294964096 }
 0x42d   :  { %1139 = vsyncpa [#allocation3], 1 }

</bundles_post_ra>
